<compile_context>
chip_gen: v7x
topology: tpu7x:2x2x1
jax: 0.10.0
libtpu: 0.0.40
codegen_flags: <defaults>
</compile_context>

<pallas_src>
import jax
import jax.numpy as jnp
import numpy as np
from jax.experimental import pallas as pl
from jax.experimental.pallas import tpu as pltpu

# pytorch3d BlendParams defaults
SIGMA = 1e-4
GAMMA = 1e-4
EPS = 1e-10
ZNEAR = 1.0
ZFAR = 100.0
INV_SIGMA = 1.0 / SIGMA
INV_GAMMA = 1.0 / GAMMA
INV_ZRANGE = 1.0 / (ZFAR - ZNEAR)


def _round_up(x, m):
    return (x + m - 1) // m * m


def make_shader2d_kernel(K, F_pad, background_color):
    # Python floats -> inlined scalar constants (no captured array constants).
    bg = tuple(float(c) for c in background_color)

    def kernel(idx_ref, bary_ref, dist_ref, zbuf_ref, tab_ref, out_ref, onehot_ref):
        # idx_ref   : (K,  TP) int32   pix_to_face (face index, -1 = empty)
        # bary_ref  : (3K, TP) f32     row = v*K + k
        # dist_ref  : (K,  TP) f32
        # zbuf_ref  : (K,  TP) f32
        # tab_ref   : (18K, K*F_pad) bf16  block-diag color table, rows [0:9K) hi / [9K:18K) lo
        # out_ref   : (4,  TP) f32     RGBA, channel-first, lane-dense
        # onehot_ref: (K*F_pad, TP) bf16 scratch
        idx = idx_ref[...]                                           # (K, TP)
        mask = (idx >= 0).astype(jnp.float32)                        # (K, TP)

        # --- softmax_rgb_blend weights: stable sigmoid(-d/sigma) * mask ------
        x = dist_ref[...] * INV_SIGMA
        t = jnp.exp(-jnp.abs(x))                                     # always <= 1, no overflow
        prob = mask * jnp.where(x >= 0.0, t, 1.0) / (1.0 + t)        # (K, TP)

        one_minus = 1.0 - prob
        alpha = one_minus[0:1, :]
        for k in range(1, K):                                        # unrolled product
            alpha = alpha * one_minus[k:k + 1, :]                    # (1, TP)

        z_inv = (ZFAR - zbuf_ref[...]) * INV_ZRANGE * mask           # (K, TP)
        z_inv_max = jnp.maximum(jnp.max(z_inv, axis=0, keepdims=True), EPS)
        weights_num = prob * jnp.exp((z_inv - z_inv_max) * INV_GAMMA)
        delta = jnp.maximum(jnp.exp((EPS - z_inv_max) * INV_GAMMA), EPS)
        denom = jnp.sum(weights_num, axis=0, keepdims=True) + delta
        inv_denom = 1.0 / denom                                      # (1, TP)

        # --- in-kernel face-color lookup: per-k one-hot + ONE MXU matmul -----
        TP = idx.shape[1]
        f_iota = jax.lax.broadcasted_iota(jnp.int32, (F_pad, TP), 0)
        for k in range(K):
            eq = f_iota == idx[k:k + 1, :]                           # (F_pad, TP)
            onehot_ref[k * F_pad:(k + 1) * F_pad, :] = (
                jnp.where(eq, 1.0, 0.0).astype(jnp.bfloat16))
        # (18K, K*F_pad) @ (K*F_pad, TP) -> (18K, TP) f32; one-hot is exact in
        # bf16 and the table is hi/lo split, so the gather is f32-accurate.
        fcol2 = jnp.dot(tab_ref[...], onehot_ref[...],
                        preferred_element_type=jnp.float32)
        fcol = fcol2[0:9 * K, :] + fcol2[9 * K:18 * K, :]            # (9K, TP), row=(v*3+c)*K+k

        # --- barycentric interpolation + weighted blend, channel by channel --
        # NOTE: for K in {1,2,4,8} the K-row slices never cross an (8,128) tile.
        for c in range(3):
            col = bary_ref[0:K, :] * fcol[c * K:(c + 1) * K, :]
            for v in range(1, 3):
                col = col + (bary_ref[v * K:(v + 1) * K, :]
                             * fcol[(v * 3 + c) * K:(v * 3 + c + 1) * K, :])
            wcol = jnp.sum(weights_num * col, axis=0, keepdims=True)  # (1, TP)
            out_ref[c:c + 1, :] = (wcol + delta * bg[c]) * inv_denom
        out_ref[3:4, :] = 1.0 - alpha

    return kernel


def shader2d_forward(pix_to_face, bary_coords, zbuf, dists,
                     verts_colors, faces,
                     background_color=(0.0, 0.0, 0.0), tile_p=8192):
    """Pallas implementation of Shader2D.forward with blend=RenderingBlend.soft."""
    N, H, W, K = pix_to_face.shape
    P = N * H * W
    F = faces.shape[0]
    f32 = jnp.float32

    # --- tiny per-mesh color table (resident in VMEM across grid steps) ------
    # rows of table9: v*3 + c ; pad F to a bf16-sublane-friendly multiple of 16.
    F_pad = max(_round_up(F, 16), 16)
    face_verts_colors = verts_colors[faces].astype(f32)                  # (F, 3v, 3c)
    table9 = jnp.transpose(face_verts_colors, (1, 2, 0)).reshape(9, F)   # (9, F)
    table9 = jnp.pad(table9, ((0, 0), (0, F_pad - F)))                   # (9, F_pad)
    # hi/lo bf16 split -> exact f32 reconstruction through the bf16 MXU path.
    t_hi = table9.astype(jnp.bfloat16)
    t_lo = (table9 - t_hi.astype(f32)).astype(jnp.bfloat16)
    eye = jnp.eye(K, dtype=jnp.bfloat16)

    def block_diag(t):  # (9, F_pad) -> (9K, K*F_pad), row = (v*3+c)*K + k
        bd = t[:, None, None, :] * eye[None, :, :, None]                 # exact (x*1 / x*0)
        return bd.reshape(9 * K, K * F_pad)

    tab = jnp.concatenate([block_diag(t_hi), block_diag(t_lo)], axis=0)  # (18K, K*F_pad)

    # --- per-pixel streams: pixel on the lane axis, small axes on sublanes ---
    pix_flat = pix_to_face.reshape(P, K).astype(jnp.int32)
    idx_t = jnp.transpose(pix_flat, (1, 0))                              # (K, P) int32
    bary_t = jnp.transpose(bary_coords.reshape(P, K, 3).astype(f32),
                           (2, 1, 0)).reshape(3 * K, P)                  # (3K, P)
    dist_t = jnp.transpose(dists.reshape(P, K).astype(f32), (1, 0))      # (K, P)
    zbuf_t = jnp.transpose(zbuf.reshape(P, K).astype(f32), (1, 0))       # (K, P)

    # --- tiling: lane-dense, >=2 grid steps when possible (v7x megacore) -----
    tile_p = int(min(max(tile_p, 128), 16384))
    tile_p = _round_up(tile_p, 128)
    tile_p = min(tile_p, max(128, _round_up(pl.cdiv(P, 2), 128)))
    grid = pl.cdiv(P, tile_p)

    vmem_limit = int(min(48 * 1024 * 1024, max(32 * 1024 * 1024, tile_p * 4096)))

    kernel = make_shader2d_kernel(K, F_pad, background_color)

    out = pl.pallas_call(
        kernel,
        out_shape=jax.ShapeDtypeStruct((4, P), f32),
        grid=(grid,),
        in_specs=[
            pl.BlockSpec((K, tile_p), lambda i: (0, i)),
            pl.BlockSpec((3 * K, tile_p), lambda i: (0, i)),
            pl.BlockSpec((K, tile_p), lambda i: (0, i)),
            pl.BlockSpec((K, tile_p), lambda i: (0, i)),
            pl.BlockSpec((18 * K, K * F_pad), lambda i: (0, 0)),   # grid-resident table
        ],
        out_specs=pl.BlockSpec((4, tile_p), lambda i: (0, i)),
        scratch_shapes=[pltpu.VMEM((K * F_pad, tile_p), jnp.bfloat16)],
        compiler_params=pltpu.CompilerParams(
            dimension_semantics=("parallel",),
            vmem_limit_bytes=vmem_limit),
    )(idx_t, bary_t, dist_t, zbuf_t, tab)

    images = jnp.transpose(out, (1, 0)).reshape(N, H, W, 4)
    return images


def shader2d_reference(pix_to_face, bary_coords, zbuf, dists,
                       verts_colors, faces, background_color=(0.0, 0.0, 0.0)):
    """Pure-JAX mirror of pytorch3d sample_textures + softmax_rgb_blend."""
    N, H, W, K = pix_to_face.shape
    maskb = pix_to_face >= 0
    mask = maskb.astype(jnp.float32)
    face_verts_colors = verts_colors[faces].astype(jnp.float32)       # (F, 3, 3)
    gathered = face_verts_colors[jnp.maximum(pix_to_face, 0)]         # (N,H,W,K,3,3)
    colors = jnp.sum(bary_coords.astype(jnp.float32)[..., :, None] * gathered, axis=-2)
    colors = jnp.where(maskb[..., None], colors, 0.0)

    prob = jax.nn.sigmoid(-dists.astype(jnp.float32) * INV_SIGMA) * mask
    alpha = jnp.prod(1.0 - prob, axis=-1)
    z_inv = (ZFAR - zbuf.astype(jnp.float32)) * INV_ZRANGE * mask
    z_inv_max = jnp.maximum(jnp.max(z_inv, axis=-1, keepdims=True), EPS)
    weights_num = prob * jnp.exp((z_inv - z_inv_max) * INV_GAMMA)
    delta = jnp.maximum(jnp.exp((EPS - z_inv_max) * INV_GAMMA), EPS)
    denom = jnp.sum(weights_num, axis=-1, keepdims=True) + delta
    bg = jnp.array(background_color, dtype=jnp.float32)
    weighted_colors = jnp.sum(weights_num[..., None] * colors, axis=-2)
    rgb = (weighted_colors + delta * bg) / denom
    return jnp.concatenate([rgb, (1.0 - alpha)[..., None]], axis=-1)


if __name__ == "__main__":
    # Small synthetic "fragments" + "meshes" consistent with the pytorch3d API.
    N, H, W, K = 2, 16, 16, 4
    V, F = 12, 20
    key = jax.random.PRNGKey(0)
    k1, k2, k3, k4, k5, k6 = jax.random.split(key, 6)

    pix_to_face = jax.random.randint(k1, (N, H, W, K), minval=-1, maxval=F,
                                     dtype=jnp.int32)
    bary_raw = jax.random.uniform(k2, (N, H, W, K, 3), minval=0.05, maxval=1.0)
    bary_coords = bary_raw / jnp.sum(bary_raw, axis=-1, keepdims=True)
    zbuf = jax.random.uniform(k3, (N, H, W, K), minval=ZNEAR, maxval=ZFAR)
    zbuf = jnp.where(pix_to_face >= 0, zbuf, -1.0)
    dists = jax.random.normal(k4, (N, H, W, K)) * 5e-5
    verts_colors = jax.random.uniform(k5, (V, 3))                    # deterministic "texture"
    faces = jax.random.randint(k6, (F, 3), minval=0, maxval=V, dtype=jnp.int32)

    background_color = (0.0, 0.0, 0.0)   # Shader2D default

    images = shader2d_forward(pix_to_face, bary_coords, zbuf, dists,
                              verts_colors, faces, background_color)
    images = jax.block_until_ready(images)

    ref = shader2d_reference(pix_to_face, bary_coords, zbuf, dists,
                             verts_colors, faces, background_color)
    ref = jax.block_until_ready(ref)

    assert images.shape == (N, H, W, 4)
    np.testing.assert_allclose(np.asarray(images), np.asarray(ref),
                               rtol=1e-4, atol=1e-4)
    print("KERNEL_OK")
</pallas_src>

<mosaic_0001>
module attributes {stable_mosaic.version = 11 : i64} {
  func.func @kernel(%arg0: i32, %arg1: memref<4x256xi32, #tpu.memory_space<vmem>>, %arg2: memref<12x256xf32, #tpu.memory_space<vmem>>, %arg3: memref<4x256xf32, #tpu.memory_space<vmem>>, %arg4: memref<4x256xf32, #tpu.memory_space<vmem>>, %arg5: memref<72x128xbf16, #tpu.memory_space<vmem>>, %arg6: memref<4x256xf32, #tpu.memory_space<vmem>>, %arg7: memref<128x256xbf16, #tpu.memory_space<vmem>>) attributes {dimension_semantics = [#tpu.dimension_semantics<parallel>], iteration_bounds = array<i64: 2>, scalar_prefetch = 0 : i64, scratch_operands = 1 : i64, tpu.core_type = #tpu.core_type<tc>, window_params = [{transform_indices = @transform_0, window_bounds = array<i64: 4, 256>}, {transform_indices = @transform_1, window_bounds = array<i64: 12, 256>}, {transform_indices = @transform_2, window_bounds = array<i64: 4, 256>}, {transform_indices = @transform_3, window_bounds = array<i64: 4, 256>}, {pipeline_mode = #tpu.pipeline_mode<synchronous>, transform_indices = @transform_4, window_bounds = array<i64: 72, 128>}, {transform_indices = @transform_5, window_bounds = array<i64: 4, 256>}]} {
    %c0 = arith.constant 0 : index
    %c0_0 = arith.constant 0 : index
    %0 = vector.load %arg1[%c0, %c0_0] : memref<4x256xi32, #tpu.memory_space<vmem>>, vector<4x256xi32>
    %c0_i32 = arith.constant 0 : i32
    %1 = vector.broadcast %c0_i32 : i32 to vector<4x256xi32>
    %2 = arith.cmpi sge, %0, %1 : vector<4x256xi32>
    %3 = arith.extui %2 : vector<4x256xi1> to vector<4x256xi32>
    %4 = arith.sitofp %3 : vector<4x256xi32> to vector<4x256xf32>
    %c0_1 = arith.constant 0 : index
    %c0_2 = arith.constant 0 : index
    %5 = vector.load %arg3[%c0_1, %c0_2] : memref<4x256xf32, #tpu.memory_space<vmem>>, vector<4x256xf32>
    %cst = arith.constant 1.000000e+04 : f32
    %6 = vector.broadcast %cst : f32 to vector<4x256xf32>
    %7 = arith.mulf %5, %6 : vector<4x256xf32>
    %8 = math.absf %7 : vector<4x256xf32>
    %cst_3 = arith.constant 0.000000e+00 : f32
    %9 = vector.broadcast %cst_3 : f32 to vector<4x256xf32>
    %10 = arith.subf %9, %8 : vector<4x256xf32>
    %11 = math.exp %10 : vector<4x256xf32>
    %cst_4 = arith.constant 0.000000e+00 : f32
    %12 = vector.broadcast %cst_4 : f32 to vector<4x256xf32>
    %13 = arith.cmpf oge, %7, %12 : vector<4x256xf32>
    %cst_5 = arith.constant 1.000000e+00 : f32
    %14 = vector.broadcast %cst_5 : f32 to vector<4x256xf32>
    %15 = arith.select %13, %11, %14 : vector<4x256xi1>, vector<4x256xf32>
    %16 = arith.mulf %4, %15 : vector<4x256xf32>
    %cst_6 = arith.constant 1.000000e+00 : f32
    %17 = vector.broadcast %cst_6 : f32 to vector<4x256xf32>
    %18 = arith.addf %17, %11 : vector<4x256xf32>
    %19 = arith.divf %16, %18 : vector<4x256xf32>
    %cst_7 = arith.constant 1.000000e+00 : f32
    %20 = vector.broadcast %cst_7 : f32 to vector<4x256xf32>
    %21 = arith.subf %20, %19 : vector<4x256xf32>
    %22 = vector.extract_strided_slice %21 {offsets = [0, 0], sizes = [1, 256], strides = [1, 1]} : vector<4x256xf32> to vector<1x256xf32>
    %23 = vector.extract_strided_slice %21 {offsets = [1, 0], sizes = [1, 256], strides = [1, 1]} : vector<4x256xf32> to vector<1x256xf32>
    %24 = arith.mulf %22, %23 : vector<1x256xf32>
    %25 = vector.extract_strided_slice %21 {offsets = [2, 0], sizes = [1, 256], strides = [1, 1]} : vector<4x256xf32> to vector<1x256xf32>
    %26 = arith.mulf %24, %25 : vector<1x256xf32>
    %27 = vector.extract_strided_slice %21 {offsets = [3, 0], sizes = [1, 256], strides = [1, 1]} : vector<4x256xf32> to vector<1x256xf32>
    %28 = arith.mulf %26, %27 : vector<1x256xf32>
    %c0_8 = arith.constant 0 : index
    %c0_9 = arith.constant 0 : index
    %29 = vector.load %arg4[%c0_8, %c0_9] : memref<4x256xf32, #tpu.memory_space<vmem>>, vector<4x256xf32>
    %cst_10 = arith.constant 1.000000e+02 : f32
    %30 = vector.broadcast %cst_10 : f32 to vector<4x256xf32>
    %31 = arith.subf %30, %29 : vector<4x256xf32>
    %cst_11 = arith.constant 0.0101010101 : f32
    %32 = vector.broadcast %cst_11 : f32 to vector<4x256xf32>
    %33 = arith.mulf %31, %32 : vector<4x256xf32>
    %34 = arith.mulf %33, %4 : vector<4x256xf32>
    %cst_12 = arith.constant dense<0xFF800000> : vector<256xf32>
    %35 = vector.multi_reduction <maximumf>, %34, %cst_12 [0] : vector<4x256xf32> to vector<256xf32>
    %36 = vector.shape_cast %35 : vector<256xf32> to vector<1x256xf32>
    %cst_13 = arith.constant 1.000000e-10 : f32
    %37 = vector.broadcast %cst_13 : f32 to vector<1x256xf32>
    %38 = arith.maximumf %36, %37 : vector<1x256xf32>
    %39 = vector.broadcast %38 : vector<1x256xf32> to vector<4x256xf32>
    %40 = arith.subf %34, %39 : vector<4x256xf32>
    %cst_14 = arith.constant 1.000000e+04 : f32
    %41 = vector.broadcast %cst_14 : f32 to vector<4x256xf32>
    %42 = arith.mulf %40, %41 : vector<4x256xf32>
    %43 = math.exp %42 : vector<4x256xf32>
    %44 = arith.mulf %19, %43 : vector<4x256xf32>
    %cst_15 = arith.constant 1.000000e-10 : f32
    %45 = vector.broadcast %cst_15 : f32 to vector<1x256xf32>
    %46 = arith.subf %45, %38 : vector<1x256xf32>
    %cst_16 = arith.constant 1.000000e+04 : f32
    %47 = vector.broadcast %cst_16 : f32 to vector<1x256xf32>
    %48 = arith.mulf %46, %47 : vector<1x256xf32>
    %49 = math.exp %48 : vector<1x256xf32>
    %cst_17 = arith.constant 1.000000e-10 : f32
    %50 = vector.broadcast %cst_17 : f32 to vector<1x256xf32>
    %51 = arith.maximumf %49, %50 : vector<1x256xf32>
    %cst_18 = arith.constant dense<0.000000e+00> : vector<256xf32>
    %52 = vector.multi_reduction <add>, %44, %cst_18 [0] : vector<4x256xf32> to vector<256xf32>
    %53 = vector.shape_cast %52 : vector<256xf32> to vector<1x256xf32>
    %54 = arith.addf %53, %51 : vector<1x256xf32>
    %cst_19 = arith.constant 1.000000e+00 : f32
    %55 = vector.broadcast %cst_19 : f32 to vector<1x256xf32>
    %56 = arith.divf %55, %54 : vector<1x256xf32>
    %57 = tpu.iota {dimensions = array<i32: 0>} : vector<32x256xi32>
    %58 = vector.extract_strided_slice %0 {offsets = [0, 0], sizes = [1, 256], strides = [1, 1]} : vector<4x256xi32> to vector<1x256xi32>
    %59 = vector.broadcast %58 : vector<1x256xi32> to vector<32x256xi32>
    %60 = arith.cmpi eq, %57, %59 : vector<32x256xi32>
    %cst_20 = arith.constant 1.000000e+00 : f32
    %cst_21 = arith.constant 0.000000e+00 : f32
    %61 = vector.broadcast %cst_20 : f32 to vector<32x256xf32>
    %62 = vector.broadcast %cst_21 : f32 to vector<32x256xf32>
    %63 = arith.select %60, %61, %62 : vector<32x256xi1>, vector<32x256xf32>
    %64 = arith.truncf %63 : vector<32x256xf32> to vector<32x256xbf16>
    %c0_22 = arith.constant 0 : index
    %c0_23 = arith.constant 0 : index
    %65 = vector.load %arg7[%c0_22, %c0_23] : memref<128x256xbf16, #tpu.memory_space<vmem>>, vector<32x256xbf16>
    tpu.vector_store %arg7[%c0_22, %c0_23], %64 {strides = array<i32>} : memref<128x256xbf16, #tpu.memory_space<vmem>>, vector<32x256xbf16>,
    %66 = vector.extract_strided_slice %0 {offsets = [1, 0], sizes = [1, 256], strides = [1, 1]} : vector<4x256xi32> to vector<1x256xi32>
    %67 = vector.broadcast %66 : vector<1x256xi32> to vector<32x256xi32>
    %68 = arith.cmpi eq, %57, %67 : vector<32x256xi32>
    %cst_24 = arith.constant 1.000000e+00 : f32
    %cst_25 = arith.constant 0.000000e+00 : f32
    %69 = vector.broadcast %cst_24 : f32 to vector<32x256xf32>
    %70 = vector.broadcast %cst_25 : f32 to vector<32x256xf32>
    %71 = arith.select %68, %69, %70 : vector<32x256xi1>, vector<32x256xf32>
    %72 = arith.truncf %71 : vector<32x256xf32> to vector<32x256xbf16>
    %c32 = arith.constant 32 : index
    %c0_26 = arith.constant 0 : index
    %73 = vector.load %arg7[%c32, %c0_26] : memref<128x256xbf16, #tpu.memory_space<vmem>>, vector<32x256xbf16>
    tpu.vector_store %arg7[%c32, %c0_26], %72 {strides = array<i32>} : memref<128x256xbf16, #tpu.memory_space<vmem>>, vector<32x256xbf16>,
    %74 = vector.extract_strided_slice %0 {offsets = [2, 0], sizes = [1, 256], strides = [1, 1]} : vector<4x256xi32> to vector<1x256xi32>
    %75 = vector.broadcast %74 : vector<1x256xi32> to vector<32x256xi32>
    %76 = arith.cmpi eq, %57, %75 : vector<32x256xi32>
    %cst_27 = arith.constant 1.000000e+00 : f32
    %cst_28 = arith.constant 0.000000e+00 : f32
    %77 = vector.broadcast %cst_27 : f32 to vector<32x256xf32>
    %78 = vector.broadcast %cst_28 : f32 to vector<32x256xf32>
    %79 = arith.select %76, %77, %78 : vector<32x256xi1>, vector<32x256xf32>
    %80 = arith.truncf %79 : vector<32x256xf32> to vector<32x256xbf16>
    %c64 = arith.constant 64 : index
    %c0_29 = arith.constant 0 : index
    %81 = vector.load %arg7[%c64, %c0_29] : memref<128x256xbf16, #tpu.memory_space<vmem>>, vector<32x256xbf16>
    tpu.vector_store %arg7[%c64, %c0_29], %80 {strides = array<i32>} : memref<128x256xbf16, #tpu.memory_space<vmem>>, vector<32x256xbf16>,
    %82 = vector.extract_strided_slice %0 {offsets = [3, 0], sizes = [1, 256], strides = [1, 1]} : vector<4x256xi32> to vector<1x256xi32>
    %83 = vector.broadcast %82 : vector<1x256xi32> to vector<32x256xi32>
    %84 = arith.cmpi eq, %57, %83 : vector<32x256xi32>
    %cst_30 = arith.constant 1.000000e+00 : f32
    %cst_31 = arith.constant 0.000000e+00 : f32
    %85 = vector.broadcast %cst_30 : f32 to vector<32x256xf32>
    %86 = vector.broadcast %cst_31 : f32 to vector<32x256xf32>
    %87 = arith.select %84, %85, %86 : vector<32x256xi1>, vector<32x256xf32>
    %88 = arith.truncf %87 : vector<32x256xf32> to vector<32x256xbf16>
    %c96 = arith.constant 96 : index
    %c0_32 = arith.constant 0 : index
    %89 = vector.load %arg7[%c96, %c0_32] : memref<128x256xbf16, #tpu.memory_space<vmem>>, vector<32x256xbf16>
    tpu.vector_store %arg7[%c96, %c0_32], %88 {strides = array<i32>} : memref<128x256xbf16, #tpu.memory_space<vmem>>, vector<32x256xbf16>,
    %c0_33 = arith.constant 0 : index
    %c0_34 = arith.constant 0 : index
    %90 = vector.load %arg5[%c0_33, %c0_34] : memref<72x128xbf16, #tpu.memory_space<vmem>>, vector<72x128xbf16>
    %c0_35 = arith.constant 0 : index
    %c0_36 = arith.constant 0 : index
    %91 = vector.load %arg7[%c0_35, %c0_36] : memref<128x256xbf16, #tpu.memory_space<vmem>>, vector<128x256xbf16>
    %cst_37 = arith.constant dense<0.000000e+00> : vector<72x256xf32>
    %92 = tpu.matmul %90, %91, %cst_37 {dimension_numbers = #tpu.dot_dimension_numbers<[1], [0], [0], [1], [0, 0, 1, 1], [], []>} : vector<72x128xbf16>, vector<128x256xbf16>, vector<72x256xf32> -> vector<72x256xf32>
    %93 = vector.extract_strided_slice %92 {offsets = [0, 0], sizes = [36, 256], strides = [1, 1]} : vector<72x256xf32> to vector<36x256xf32>
    %94 = vector.extract_strided_slice %92 {offsets = [36, 0], sizes = [36, 256], strides = [1, 1]} : vector<72x256xf32> to vector<36x256xf32>
    %95 = arith.addf %93, %94 : vector<36x256xf32>
    %c0_38 = arith.constant 0 : index
    %c0_39 = arith.constant 0 : index
    %96 = vector.load %arg2[%c0_38, %c0_39] : memref<12x256xf32, #tpu.memory_space<vmem>>, vector<4x256xf32>
    %97 = vector.extract_strided_slice %95 {offsets = [0, 0], sizes = [4, 256], strides = [1, 1]} : vector<36x256xf32> to vector<4x256xf32>
    %98 = arith.mulf %96, %97 : vector<4x256xf32>
    %c4 = arith.constant 4 : index
    %c0_40 = arith.constant 0 : index
    %99 = vector.load %arg2[%c4, %c0_40] : memref<12x256xf32, #tpu.memory_space<vmem>>, vector<4x256xf32>
    %100 = vector.extract_strided_slice %95 {offsets = [12, 0], sizes = [4, 256], strides = [1, 1]} : vector<36x256xf32> to vector<4x256xf32>
    %101 = arith.mulf %99, %100 : vector<4x256xf32>
    %102 = arith.addf %98, %101 : vector<4x256xf32>
    %c8 = arith.constant 8 : index
    %c0_41 = arith.constant 0 : index
    %103 = vector.load %arg2[%c8, %c0_41] : memref<12x256xf32, #tpu.memory_space<vmem>>, vector<4x256xf32>
    %104 = vector.extract_strided_slice %95 {offsets = [24, 0], sizes = [4, 256], strides = [1, 1]} : vector<36x256xf32> to vector<4x256xf32>
    %105 = arith.mulf %103, %104 : vector<4x256xf32>
    %106 = arith.addf %102, %105 : vector<4x256xf32>
    %107 = arith.mulf %44, %106 : vector<4x256xf32>
    %cst_42 = arith.constant dense<0.000000e+00> : vector<256xf32>
    %108 = vector.multi_reduction <add>, %107, %cst_42 [0] : vector<4x256xf32> to vector<256xf32>
    %109 = vector.shape_cast %108 : vector<256xf32> to vector<1x256xf32>
    %cst_43 = arith.constant 0.000000e+00 : f32
    %110 = vector.broadcast %cst_43 : f32 to vector<1x256xf32>
    %111 = arith.mulf %51, %110 : vector<1x256xf32>
    %112 = arith.addf %109, %111 : vector<1x256xf32>
    %113 = arith.mulf %112, %56 : vector<1x256xf32>
    %c0_44 = arith.constant 0 : index
    %c0_45 = arith.constant 0 : index
    %114 = vector.load %arg6[%c0_44, %c0_45] : memref<4x256xf32, #tpu.memory_space<vmem>>, vector<1x256xf32>
    tpu.vector_store %arg6[%c0_44, %c0_45], %113 {strides = array<i32>} : memref<4x256xf32, #tpu.memory_space<vmem>>, vector<1x256xf32>,
    %c0_46 = arith.constant 0 : index
    %c0_47 = arith.constant 0 : index
    %115 = vector.load %arg2[%c0_46, %c0_47] : memref<12x256xf32, #tpu.memory_space<vmem>>, vector<4x256xf32>
    %116 = vector.extract_strided_slice %95 {offsets = [4, 0], sizes = [4, 256], strides = [1, 1]} : vector<36x256xf32> to vector<4x256xf32>
    %117 = arith.mulf %115, %116 : vector<4x256xf32>
    %c4_48 = arith.constant 4 : index
    %c0_49 = arith.constant 0 : index
    %118 = vector.load %arg2[%c4_48, %c0_49] : memref<12x256xf32, #tpu.memory_space<vmem>>, vector<4x256xf32>
    %119 = vector.extract_strided_slice %95 {offsets = [16, 0], sizes = [4, 256], strides = [1, 1]} : vector<36x256xf32> to vector<4x256xf32>
    %120 = arith.mulf %118, %119 : vector<4x256xf32>
    %121 = arith.addf %117, %120 : vector<4x256xf32>
    %c8_50 = arith.constant 8 : index
    %c0_51 = arith.constant 0 : index
    %122 = vector.load %arg2[%c8_50, %c0_51] : memref<12x256xf32, #tpu.memory_space<vmem>>, vector<4x256xf32>
    %123 = vector.extract_strided_slice %95 {offsets = [28, 0], sizes = [4, 256], strides = [1, 1]} : vector<36x256xf32> to vector<4x256xf32>
    %124 = arith.mulf %122, %123 : vector<4x256xf32>
    %125 = arith.addf %121, %124 : vector<4x256xf32>
    %126 = arith.mulf %44, %125 : vector<4x256xf32>
    %cst_52 = arith.constant dense<0.000000e+00> : vector<256xf32>
    %127 = vector.multi_reduction <add>, %126, %cst_52 [0] : vector<4x256xf32> to vector<256xf32>
    %128 = vector.shape_cast %127 : vector<256xf32> to vector<1x256xf32>
    %cst_53 = arith.constant 0.000000e+00 : f32
    %129 = vector.broadcast %cst_53 : f32 to vector<1x256xf32>
    %130 = arith.mulf %51, %129 : vector<1x256xf32>
    %131 = arith.addf %128, %130 : vector<1x256xf32>
    %132 = arith.mulf %131, %56 : vector<1x256xf32>
    %c1 = arith.constant 1 : index
    %c0_54 = arith.constant 0 : index
    %133 = vector.load %arg6[%c1, %c0_54] : memref<4x256xf32, #tpu.memory_space<vmem>>, vector<1x256xf32>
    tpu.vector_store %arg6[%c1, %c0_54], %132 {strides = array<i32>} : memref<4x256xf32, #tpu.memory_space<vmem>>, vector<1x256xf32>,
    %c0_55 = arith.constant 0 : index
    %c0_56 = arith.constant 0 : index
    %134 = vector.load %arg2[%c0_55, %c0_56] : memref<12x256xf32, #tpu.memory_space<vmem>>, vector<4x256xf32>
    %135 = vector.extract_strided_slice %95 {offsets = [8, 0], sizes = [4, 256], strides = [1, 1]} : vector<36x256xf32> to vector<4x256xf32>
    %136 = arith.mulf %134, %135 : vector<4x256xf32>
    %c4_57 = arith.constant 4 : index
    %c0_58 = arith.constant 0 : index
    %137 = vector.load %arg2[%c4_57, %c0_58] : memref<12x256xf32, #tpu.memory_space<vmem>>, vector<4x256xf32>
    %138 = vector.extract_strided_slice %95 {offsets = [20, 0], sizes = [4, 256], strides = [1, 1]} : vector<36x256xf32> to vector<4x256xf32>
    %139 = arith.mulf %137, %138 : vector<4x256xf32>
    %140 = arith.addf %136, %139 : vector<4x256xf32>
    %c8_59 = arith.constant 8 : index
    %c0_60 = arith.constant 0 : index
    %141 = vector.load %arg2[%c8_59, %c0_60] : memref<12x256xf32, #tpu.memory_space<vmem>>, vector<4x256xf32>
    %142 = vector.extract_strided_slice %95 {offsets = [32, 0], sizes = [4, 256], strides = [1, 1]} : vector<36x256xf32> to vector<4x256xf32>
    %143 = arith.mulf %141, %142 : vector<4x256xf32>
    %144 = arith.addf %140, %143 : vector<4x256xf32>
    %145 = arith.mulf %44, %144 : vector<4x256xf32>
    %cst_61 = arith.constant dense<0.000000e+00> : vector<256xf32>
    %146 = vector.multi_reduction <add>, %145, %cst_61 [0] : vector<4x256xf32> to vector<256xf32>
    %147 = vector.shape_cast %146 : vector<256xf32> to vector<1x256xf32>
    %cst_62 = arith.constant 0.000000e+00 : f32
    %148 = vector.broadcast %cst_62 : f32 to vector<1x256xf32>
    %149 = arith.mulf %51, %148 : vector<1x256xf32>
    %150 = arith.addf %147, %149 : vector<1x256xf32>
    %151 = arith.mulf %150, %56 : vector<1x256xf32>
    %c2 = arith.constant 2 : index
    %c0_63 = arith.constant 0 : index
    %152 = vector.load %arg6[%c2, %c0_63] : memref<4x256xf32, #tpu.memory_space<vmem>>, vector<1x256xf32>
    tpu.vector_store %arg6[%c2, %c0_63], %151 {strides = array<i32>} : memref<4x256xf32, #tpu.memory_space<vmem>>, vector<1x256xf32>,
    %cst_64 = arith.constant 1.000000e+00 : f32
    %153 = vector.broadcast %cst_64 : f32 to vector<1x256xf32>
    %154 = arith.subf %153, %28 : vector<1x256xf32>
    %c3 = arith.constant 3 : index
    %c0_65 = arith.constant 0 : index
    %155 = vector.load %arg6[%c3, %c0_65] : memref<4x256xf32, #tpu.memory_space<vmem>>, vector<1x256xf32>
    tpu.vector_store %arg6[%c3, %c0_65], %154 {strides = array<i32>} : memref<4x256xf32, #tpu.memory_space<vmem>>, vector<1x256xf32>,
    return
  }
  func.func @transform_0(%arg0: i32) -> (i32, i32) {
    %c0_i32 = arith.constant 0 : i32
    %c0_i32_0 = arith.constant 0 : i32
    return %c0_i32, %arg0 : i32, i32
  }
  func.func @transform_1(%arg0: i32) -> (i32, i32) {
    %c0_i32 = arith.constant 0 : i32
    %c0_i32_0 = arith.constant 0 : i32
    return %c0_i32, %arg0 : i32, i32
  }
  func.func @transform_2(%arg0: i32) -> (i32, i32) {
    %c0_i32 = arith.constant 0 : i32
    %c0_i32_0 = arith.constant 0 : i32
    return %c0_i32, %arg0 : i32, i32
  }
  func.func @transform_3(%arg0: i32) -> (i32, i32) {
    %c0_i32 = arith.constant 0 : i32
    %c0_i32_0 = arith.constant 0 : i32
    return %c0_i32, %arg0 : i32, i32
  }
  func.func @transform_4(%arg0: i32) -> (i32, i32) {
    %c0_i32 = arith.constant 0 : i32
    %c0_i32_0 = arith.constant 0 : i32
    %c0_i32_1 = arith.constant 0 : i32
    return %c0_i32, %c0_i32_0 : i32, i32
  }
  func.func @transform_5(%arg0: i32) -> (i32, i32) {
    %c0_i32 = arith.constant 0 : i32
    %c0_i32_0 = arith.constant 0 : i32
    return %c0_i32, %arg0 : i32, i32
  }
}

</mosaic_0001>

<bundles_post_ra>
// kernel: tpu_custom_call.1
= control target key start
LH: loop header
LB: loop body
LE: loop exit
PB: predicated region body
PF: predicated region fallthrough
CT: control target
= control target key end

     0   :  { %s2214_s0 = inlined_call_operand.hbm [shape: s32[4,512], index: 0, kind: input, shape index: {}]   ;;  %s2215_s1 = inlined_call_operand.hbm [shape: f32[12,512], index: 1, kind: input, shape index: {}]   ;;  %s2216_s2 = inlined_call_operand.hbm [shape: f32[4,512], index: 2, kind: input, shape index: {}]   ;;  %s2217_s3 = inlined_call_operand.hbm [shape: f32[4,512], index: 3, kind: input, shape index: {}]   ;;  %s2218_s4 = inlined_call_operand.hbm [shape: bf16[72,128], index: 4, kind: input, shape index: {}]   ;;  %s2219_s5 = inlined_call_operand.hbm [shape: f32[4,512], index: 5, kind: output, shape index: {}]  }
   0x1   :  { %2226 = sst [smem:[#allocation19_spill]] %s2215_s1 }
   0x2   :  { %2227 = sst [smem:[#allocation20_spill]] %s2218_s4 }
   0x3   :  { %10 = vsyncpa [#allocation4], 0 }
   0x4   :  { %12 = vsyncpa [#allocation4 + $0x1], 0 }
   0x5   :  { %13 = vsyncpa [#allocation7], 0 }
   0x6   :  { %15 = vsyncpa [#allocation7 + $0x1], 0 }
   0x7   :  { %16 = vsyncpa [#allocation10], 0 }
   0x8   :  { %18 = vsyncpa [#allocation10 + $0x1], 0 }
   0x9   :  { %19 = vsyncpa [#allocation5], 0 }
   0xa   :  { %21 = vsyncpa [#allocation5 + $0x1], 0  ;;  %s1689_s18 = smov 0   ;;  %s1691_s19 = smov 0  }
   0xb   :  { %s1693_s20 = smov 0   ;;  %s1695_s21 = smov 0  }
   0xc LB: > { %s1710_s22 = sadd.s32 4294967295, %s1642_s21   ;;  %s1223_s23 = sadd.s32 4294967294, %s1642_s21   ;;  %s1642_s21 = sphi %s1695_s21, %s2259_s21   ;;  %s1638_s20 = sphi %s1693_s20, %s2258_s20   ;;  %s1634_s19 = sphi %s1691_s19, %s2257_s19   ;;  %s1630_s18 = sphi %s1689_s18, %s2256_s18  }
   0xd   : > { %s1714_s24 = sadd.s32 1, %s1642_s21   ;;  %s34_s25 = sadd.s32 1, %s1638_s20 }
   0xe   : > { %s31_s26 = ssub.s32 %s1642_s21, %s1714_s24  ;;  %p41_p0 = scmp.ne.s32.totalorder %s1638_s20, %s1634_s19 }
   0xf   : > { %p32_p1 = scmp.eq.s32.totalorder %s31_s26, 0  ;;  %p42_p2 = scmp.eq.s32.totalorder %s1642_s21, 0 }
  0x10   : > { %p47_p3 = scmp.ne.s32.totalorder %s1634_s19, %s1630_s18  ;;  %p2220_p4 = scmp.eq.s32.totalorder %s1710_s22, 0 }
  0x11   : > { %s1726_s27 = scalar_select %p32_p1, %s1638_s20, %s34_s25  }
  0x12   : > { %p1728_p5 = por %p42_p2, %p41_p0  ;;  %p1734_p6 = por %p2220_p4, %p47_p3 }
  0x13   : > { %2228 = sst [smem:[#allocation18_spill]] %s1726_s27  ;;  %p170_p7 = scmp.eq.s32.totalorder %s1710_s22, 1 }
  0x14   : > { %s2229_s28 = scalar_select %p1728_p5, 1, 0 }
  0x15   : > { %s2230_s29 = scalar_select %p1734_p6, 1, 0 }
  0x16   : > { %p176_p8 = scmp.eq.s32.totalorder %s1223_s23, 1  ;;  %p1224_p9 = scmp.ge.s32.totalorder %s1642_s21, 1 }
  0x17   : > { %p183_p10 = scmp.lt.s32.totalorder %s1642_s21, 3  ;;  %p1741_p11 = por %p170_p7, %p41_p0 }
  0x18   : > { %p1745_p12 = por %p176_p8, %p47_p3  ;;  %s1644_s8 = smov [#allocation11]  }
  0x19   : > { %s2231_s30 = scalar_select %p1741_p11, 1, 0 }
  0x1a   : > { %s2232_s6 = scalar_select %p1745_p12, 1, 0 }
  0x1b   : > { %p1749_p13 = pnand %p1224_p9, %p183_p10  ;;  %s195_s9 = sshll.u32 %s1644_s8, 4  ;;  %s196_s9 = int_to_ptr.vmem [resolvable:$true] %s195_s9 }
  0x1c   : > { %s1764_s11 = sand.u32 1, %s1638_s20   ;;  %s2235_s4 = sld [smem:[#allocation20_spill]] }
  0x1d   : > { %s2233_s7 = scalar_select %p1749_p13, 1, 0 }
  0x1e   : > { %p1330_p1 = pneg %p1749_p13 }
  0x20   : > { %p1757_p2 = pnand %p1330_p1, %p2220_p4 }
  0x22   : > { %s1416_s15 = scalar_lea.hbm %s2235_s4, 576  ;;  %p1418_p8 = pneg %p1757_p2 }
  0x23   : > { %p1417_p7 = scmp.ne.s32.totalorder %s2235_s4, %s1416_s15  ;;  %p1423_p1 = scmp.lt.u32.totalorder %s1416_s15, %s2235_s4 }
  0x25   : > { %p1419_p9 = pnand %p1418_p8, %p1417_p7 }
  0x27   : > { %p1420_p10 = pneg %p1419_p9 }
  0x29   : > { %p1425_p0 = pnand %p1423_p1, %p1420_p10 }
  0x2b   : > { %1428 = shalt.err (!%p1425_p0)
}
  0x2c   : > { %s1429_s26 = scalar_lea.vmem %s196_s9, 576  ;;  %p1437_p11 = scmp.lt.s32.totalorder %s196_s9, %s196_s9 }
  0x2d   : > { %p1430_p4 = scmp.ne.s32.totalorder %s196_s9, %s1429_s26  ;;  %p1438_p6 = scmp.lt.s32.totalorder %s1429_s26, %s1429_s26 }
  0x2f   : > { %p1432_p3 = pnand %p1430_p4, %p1418_p8  ;;  %p1439_p13 = por %p1438_p6, %p1437_p11 }
  0x31   : > { %p1433_p12 = pneg %p1432_p3 }
  0x33   : > { %p1440_p5 = pnand %p1439_p13, %p1433_p12 }
  0x35   : > { %1443 = shalt.err (!%p1440_p5)
}
  0x36   : > { %s1645_s8 = smov 64   ;;  %s1646_s13 = smov 4  }
  0x37   : > { %1333 = dma.hbm_to_vmem [thread:$0]  (!%p1757_p2), %s2235_s4, 576, %s196_s9, [#allocation10], %s1645_s8, %s1645_s8, %s1646_s13  }
  0x38   : > { %p2236_p4 = scmp.ne.s32.totalorder %s2229_s28, 0  ;;  %p2237_p0 = scmp.lt.s32.totalorder %s1642_s21, 2 }
  0x39   : > { %s1230_s17 = sshll.u32 %s1764_s11, 5  ;;  %s1264_s23 = sshll.u32 %s1642_s21, 8 }
  0x3a   : > { %p1787_p3 = pnand %p2237_p0, %p2236_p4  ;;  %s2239_s1 = sld [smem:[#allocation19_spill]] }
  0x3b   : > { %s232_s10 = scalar_lea.vmem [#allocation6], %s1230_s17  ;;  %s2240_s28 = sand.u32 1, %s1642_s21  }
  0x3c   : > { %s2238_s16 = scalar_select %p1787_p3, 1, 0 }
  0x3d   : > { %s239_s9 = sshll.u32 %s232_s10, 4  ;;  %s1802_s8 = scalar_lea.sflag [#allocation7], %s2240_s28  ;;  %s1798_s9 = int_to_ptr.vmem [resolvable:$true] %s239_s9 }
  0x3e   : > { %p1808_p6 = pneg %p1787_p3 }
  0x40   : > { %s1796_s12 = scalar_lea.hbm %s2239_s1, %s1264_s23  ;;  %s1449_s17 = scalar_lea.hbm %s2239_s1, 1024 }
  0x41   : > { %s1444_s13 = scalar_lea.hbm %s1796_s12, 512  ;;  %p1450_p13 = scmp.lt.u32.totalorder %s1796_s12, %s2239_s1 }
  0x42   : > { %p1445_p5 = scmp.ne.s32.totalorder %s1796_s12, %s1444_s13  ;;  %p1451_p2 = scmp.lt.u32.totalorder %s1449_s17, %s1444_s13 }
  0x43   : > { %p1453_p8 = scmp.lt.u32.totalorder %s1444_s13, %s1796_s12 }
  0x44   : > { %p1447_p11 = pnand %p1808_p6, %p1445_p5  ;;  %p1452_p7 = por %p1451_p2, %p1450_p13 }
  0x46   : > { %p1448_p12 = pneg %p1447_p11  ;;  %p1454_p9 = por %p1453_p8, %p1452_p7 }
  0x48   : > { %p1455_p10 = pnand %p1454_p9, %p1448_p12 }
  0x4a   : > { %1458 = shalt.err (!%p1455_p10)
}
  0x4b   : > { %s1459_s10 = scalar_lea.vmem %s1798_s9, 512  ;;  %s1647_s28 = smov [#allocation6]  }
  0x4c   : > { %p1460_p1 = scmp.ne.s32.totalorder %s1798_s9, %s1459_s10  ;;  %s1464_s15 = sshll.u32 %s1647_s28, 4  ;;  %s1465_s15 = int_to_ptr.vmem [resolvable:$false] %s1464_s15 }
  0x4d   : > { %s1466_s23 = scalar_lea.vmem %s1465_s15, 1024  ;;  %p1467_p5 = scmp.lt.s32.totalorder %s1798_s9, %s1465_s15 }
  0x4e   : > { %p1462_p4 = pnand %p1460_p1, %p1808_p6  ;;  %p1468_p11 = scmp.lt.s32.totalorder %s1466_s23, %s1459_s10 }
  0x50   : > { %p1463_p0 = pneg %p1462_p4  ;;  %p1469_p13 = por %p1468_p11, %p1467_p5 }
  0x52   : > { %p1470_p2 = pnand %p1469_p13, %p1463_p0 }
  0x54   : > { %1473 = shalt.err (!%p1470_p2)
}
  0x55   : > { %s1648_s13 = smov 512   ;;  %s1649_s17 = smov 256  }
  0x56   : > { %s1650_s25 = smov 16   ;;  %s1833_s26 = sshll.u32 %s1764_s11, 3 }
  0x57   : > { %1340 = dma.hbm_to_vmem [thread:$0]  (!%p1787_p3), %s1796_s12, 512, %s1798_s9, %s1802_s8, %s1648_s13, %s1649_s17, %s1650_s25  }
  0x58   : > { %s1836_s10 = sshll.u32 %s1642_s21, 7  ;;  %s213_s1 = scalar_lea.vmem [#allocation3], %s1833_s26 }
  0x59   : > { %s1842_s23 = scalar_lea.hbm %s2214_s0, %s1836_s10  ;;  %s221_s4 = sshll.u32 %s213_s1, 4  ;;  %s222_s4 = int_to_ptr.vmem [resolvable:$true] %s221_s4 }
  0x5a   : > { %s210_s27 = scalar_lea.sflag [#allocation4], %s1764_s11  ;;  %s1474_s12 = scalar_lea.hbm %s1842_s23, 128 }
  0x5b   : > { %p1475_p12 = scmp.ne.s32.totalorder %s1842_s23, %s1474_s12  ;;  %s1479_s17 = scalar_lea.hbm %s2214_s0, 256 }
  0x5c   : > { %p1480_p9 = scmp.lt.u32.totalorder %s1842_s23, %s2214_s0  ;;  %p1481_p10 = scmp.lt.u32.totalorder %s1479_s17, %s1474_s12 }
  0x5d   : > { %p1477_p7 = pnand %p1475_p12, %p1808_p6  ;;  %p1483_p4 = scmp.lt.u32.totalorder %s1474_s12, %s1842_s23 }
  0x5e   : > { %p1482_p1 = por %p1481_p10, %p1480_p9 }
  0x5f   : > { %p1478_p8 = pneg %p1477_p7 }
  0x60   : > { %p1484_p0 = por %p1483_p4, %p1482_p1 }
  0x62   : > { %p1485_p5 = pnand %p1484_p0, %p1478_p8 }
  0x64   : > { %1488 = shalt.err (!%p1485_p5)
}
  0x65   : > { %s1489_s1 = scalar_lea.vmem %s222_s4, 128  ;;  %s1651_s11 = smov [#allocation3]  }
  0x66   : > { %p1490_p11 = scmp.ne.s32.totalorder %s222_s4, %s1489_s1  ;;  %s1494_s15 = sshll.u32 %s1651_s11, 4  ;;  %s1495_s15 = int_to_ptr.vmem [resolvable:$false] %s1494_s15 }
  0x67   : > { %s1496_s9 = scalar_lea.vmem %s1495_s15, 256  ;;  %p1497_p12 = scmp.lt.s32.totalorder %s222_s4, %s1495_s15 }
  0x68   : > { %p1492_p13 = pnand %p1490_p11, %p1808_p6  ;;  %p1498_p7 = scmp.lt.s32.totalorder %s1496_s9, %s1489_s1 }
  0x6a   : > { %p1493_p2 = pneg %p1492_p13  ;;  %p1499_p3 = por %p1498_p7, %p1497_p12 }
  0x6c   : > { %p1500_p9 = pnand %p1499_p3, %p1493_p2 }
  0x6e   : > { %1503 = shalt.err (!%p1500_p9)
}
  0x6f   : > { %p2242_p10 = scmp.ne.s32.totalorder %s2238_s16, 0  ;;  %s1867_s17 = scalar_lea.hbm %s2216_s2, %s1836_s10 }
  0x70   : > { %s253_s25 = scalar_lea.vmem [#allocation8], %s1833_s26  ;;  %s1504_s1 = scalar_lea.hbm %s1867_s17, 128 }
  0x71   : > { %1337 = dma.hbm_to_vmem [thread:$0]  (!%p2242_p10), %s1842_s23, 128, %s222_s4, %s210_s27  }
  0x72   : > { %s261_s28 = sshll.u32 %s253_s25, 4  ;;  %p1505_p3 = scmp.ne.s32.totalorder %s1867_s17, %s1504_s1  ;;  %s262_s28 = int_to_ptr.vmem [resolvable:$true] %s261_s28 }
  0x73   : > { %s1509_s4 = scalar_lea.hbm %s2216_s2, 256  ;;  %p1510_p4 = scmp.lt.u32.totalorder %s1867_s17, %s2216_s2 }
  0x74   : > { %p1507_p8 = pnand %p1505_p3, %p1808_p6  ;;  %p1511_p0 = scmp.lt.u32.totalorder %s1509_s4, %s1504_s1 }
  0x75   : > { %p1513_p11 = scmp.lt.u32.totalorder %s1504_s1, %s1867_s17 }
  0x76   : > { %p1508_p1 = pneg %p1507_p8  ;;  %p1512_p5 = por %p1511_p0, %p1510_p4 }
  0x78   : > { %p1514_p13 = por %p1513_p11, %p1512_p5 }
  0x7a   : > { %p1515_p2 = pnand %p1514_p13, %p1508_p1 }
  0x7c   : > { %1518 = shalt.err (!%p1515_p2)
}
  0x7d   : > { %s1519_s9 = scalar_lea.vmem %s262_s28, 128  ;;  %s1652_s12 = smov [#allocation8]  }
  0x7e   : > { %p1520_p12 = scmp.ne.s32.totalorder %s262_s28, %s1519_s9  ;;  %s1524_s13 = sshll.u32 %s1652_s12, 4  ;;  %s1525_s13 = int_to_ptr.vmem [resolvable:$false] %s1524_s13 }
  0x7f   : > { %s1526_s25 = scalar_lea.vmem %s1525_s13, 256  ;;  %p1527_p3 = scmp.lt.s32.totalorder %s262_s28, %s1525_s13 }
  0x80   : > { %p1522_p7 = pnand %p1520_p12, %p1808_p6  ;;  %p1528_p8 = scmp.lt.s32.totalorder %s1526_s25, %s1519_s9 }
  0x82   : > { %p1523_p9 = pneg %p1522_p7  ;;  %p1529_p10 = por %p1528_p8, %p1527_p3 }
  0x84   : > { %p1530_p0 = pnand %p1529_p10, %p1523_p9 }
  0x86   : > { %1533 = shalt.err (!%p1530_p0)
}
  0x87   : > { %p2243_p4 = scmp.ne.s32.totalorder %s2238_s16, 0  ;;  %s1892_s15 = scalar_lea.hbm %s2217_s3, %s1836_s10 }
  0x88   : > { %s272_s4 = scalar_lea.vmem [#allocation9], %s1833_s26  ;;  %s2244_s23 = sand.u32 1, %s1642_s21  }
  0x89   : > { %1343 = dma.hbm_to_vmem [thread:$0]  (!%p2243_p4), %s1867_s17, 128, %s262_s28, %s1802_s8  }
  0x8a   : > { %s280_s27 = sshll.u32 %s272_s4, 4  ;;  %s269_s9 = scalar_lea.sflag [#allocation10], %s2244_s23  ;;  %s281_s27 = int_to_ptr.vmem [resolvable:$true] %s280_s27 }
  0x8b   : > { %s1534_s12 = scalar_lea.hbm %s1892_s15, 128  ;;  %s1539_s28 = scalar_lea.hbm %s2217_s3, 256 }
  0x8c   : > { %p1535_p10 = scmp.ne.s32.totalorder %s1892_s15, %s1534_s12  ;;  %p1540_p11 = scmp.lt.u32.totalorder %s1892_s15, %s2217_s3 }
  0x8d   : > { %p1541_p13 = scmp.lt.u32.totalorder %s1539_s28, %s1534_s12  ;;  %p1543_p12 = scmp.lt.u32.totalorder %s1534_s12, %s1892_s15 }
  0x8e   : > { %p1537_p1 = pnand %p1535_p10, %p1808_p6 }
  0x8f   : > { %p1542_p2 = por %p1541_p13, %p1540_p11 }
  0x90   : > { %p1538_p5 = pneg %p1537_p1 }
  0x91   : > { %p1544_p7 = por %p1543_p12, %p1542_p2 }
  0x93   : > { %p1545_p9 = pnand %p1544_p7, %p1538_p5 }
  0x95   : > { %1548 = shalt.err (!%p1545_p9)
}
  0x96   : > { %s1549_s26 = scalar_lea.vmem %s281_s27, 128  ;;  %s1653_s25 = smov [#allocation9]  }
  0x97   : > { %p1550_p3 = scmp.ne.s32.totalorder %s281_s27, %s1549_s26  ;;  %s1554_s1 = sshll.u32 %s1653_s25, 4  ;;  %s1555_s1 = int_to_ptr.vmem [resolvable:$false] %s1554_s1 }
  0x98   : > { %s1556_s11 = scalar_lea.vmem %s1555_s1, 256  ;;  %p1557_p10 = scmp.lt.s32.totalorder %s281_s27, %s1555_s1 }
  0x99   : > { %p1552_p8 = pnand %p1550_p3, %p1808_p6  ;;  %p1558_p1 = scmp.lt.s32.totalorder %s1556_s11, %s1549_s26 }
  0x9b   : > { %p1553_p0 = pneg %p1552_p8  ;;  %p1559_p4 = por %p1558_p1, %p1557_p10 }
  0x9d   : > { %p1560_p11 = pnand %p1559_p4, %p1553_p0 }
  0x9f   : > { %1563 = shalt.err (!%p1560_p11)
}
  0xa0   : > { %p2245_p13 = scmp.ne.s32.totalorder %s2238_s16, 0  ;;  %p2246_p5 = scmp.ne.s32.totalorder %s2233_s7, 0 }
  0xa1   : > { %s1917_s14 = sand.u32 (!%p2246_p5), 1, %s1634_s19   ;;  %p2247_p6 = scmp.ne.s32.totalorder (!%p2246_p5), %s2230_s29, 0 }
  0xa2   : > { %1346 = dma.hbm_to_vmem [thread:$0]  (!%p2245_p13), %s1892_s15, 128, %s281_s27, %s269_s9  }
  0xa3   : > { %289 = sbr.rel (%p2246_p5) target bundleno = 511 (0x1ff), region = 40  ;;  %s1920_s4 = sshll.u32 (!%p2246_p5), %s1917_s14, 3 }
  0xa4   : > { %s292_s23 = scalar_lea.sflag (!%p2246_p5), [#allocation4], %s1917_s14  ;;  %s295_s12 = scalar_lea.vmem (!%p2246_p5), [#allocation3], %s1920_s4 }
  0xaa   : > { %1609 = dma.done.wait (%p2247_p6), %s292_s23, 128  }
  0xab   : > { %1611 = vsyncadd (%p2247_p6), %s292_s23, 4294967168  ;;  %s300_s7 = sand.u32 1, %s1710_s22   ;;  %s1241_s16 = sshll.u32 %s1917_s14, 5 }
  0xac   : > { %s301_s15 = scalar_lea.sflag [#allocation7], %s300_s7  ;;  %s1930_s27 = scalar_lea.vmem [#allocation6], %s1241_s16 }
  0xad   : > { %1613 = dma.done.wait (%p2247_p6), %s301_s15, 640  }
  0xae   : > { %1615 = vsyncadd (%p2247_p6), %s301_s15, 4294966656  ;;  %s313_s9 = scalar_lea.vmem [#allocation8], %s1920_s4  ;;  %s319_s8 = scalar_lea.sflag [#allocation10], %s300_s7 }
  0xaf   : > { %s322_s17 = scalar_lea.vmem [#allocation9], %s1920_s4 }
  0xb0   : > { %1617 = dma.done.wait (%p2247_p6), %s319_s8, 128  }
  0xb1   : > { %1619 = vsyncadd (%p2247_p6), %s319_s8, 4294967168  ;;  %p2248_p4 = scmp.eq.s32.totalorder %s1710_s22, 0 }
  0xb3   : > { %1621 = dma.done.wait (%p2248_p4), [#allocation10], 576   ;;  %p2249_p2 = pmov %p2248_p4 }
  0xb4   : > { %v470_v0 = vlaneseq  ;;  %v1654_v1 = vmov 0   ;;  %v1955_v7 = vld [vmem:[%s295_s12] sm:$0xff]  ;;  %v1655_v21 = vmov 1.0|1.0   ;;  %v1397_v32 = vld [vmem:[#allocation11] sm:$0xff]   ;;  %v1399_v34 = vld [vmem:[#allocation11 + $0x8] sm:$0xff]  }
  0xb5   : > { %1623 = vsyncadd (%p2249_p2), [#allocation10], 4294966720  ;;  %720 = vmatprep.mubr.bf16.mxu0 %v1654_v1  ;;  %750 = vmatprep.mubr.bf16.mxu1 %v1654_v1  ;;  %v1398_v33 = vld [vmem:[#allocation11 + $0x18] sm:$0xff]   ;;  %v1400_v35 = vld [vmem:[#allocation11 + $0x20] ss:$0 sps:$4 sm:$0xff]   ;;  %v1656_v40 = vmov 0.0  }
  0xb6   : > { %v1949_v2 = vshrl.u32 %v470_v0, 7  ;;  %v1401_v36 = vld [vmem:[#allocation11 + $0x10] sm:$0xff]   ;;  %v378_v44 = vld [vmem:[%s313_s9] sm:$0xff]  ;;  %s2084_s29 = scalar_lea.vmem [#allocation12], %s1920_s4  ;;  %s1267_s28 = sshll.u32 %s1710_s22, 7 }
  0xb7   : > { %v404_v37 = vld [vmem:[%s322_s17] sm:$0xff]  ;;  %v379_v45 = vmul.f32 10000.0, %v378_v44  ;;  %s1078_s10 = sshll.u32 %s2084_s29, 4  ;;  %s2161_s25 = scalar_lea.hbm %s2219_s5, %s1267_s28  ;;  %s2163_s10 = int_to_ptr.vmem [resolvable:$true] %s1078_s10 }
  0xb8   : > { %v477_v3 = vsub.s32 0, %v1949_v2  ;;  %v481_v4 = vsub.s32 4, %v1949_v2  ;;  %v517_v5 = vsub.s32 1, %v1949_v2  ;;  %v521_v6 = vsub.s32 5, %v1949_v2  ;;  %s1064_s22 = scalar_lea.sflag [#allocation5], %s1917_s14  ;;  %s1564_s1 = scalar_lea.vmem %s2163_s10, 128 }
  0xb9   : > { %v1958_v8 = vadd.s32 8, %v1949_v2  ;;  %v1965_v13 = vadd.s32 16, %v1949_v2  ;;  %v1968_v14 = vadd.s32 24, %v1949_v2  ;;  %v561_v18 = vsub.s32 6, %v1949_v2  ;;  %p1565_p12 = scmp.ne.s32.totalorder %s2163_s10, %s1564_s1  ;;  %p2252_p7 = scmp.ne.s32.totalorder %s2231_s30, 0 }
  0xba   : > { %v482_v9 = vrot.slane %v1955_v7, %v481_v4  ;;  %v478_v10 = vrot.slane %v1955_v7, %v477_v3  ;;  %v522_v11 = vrot.slane %v1955_v7, %v521_v6  ;;  %v518_v12 = vrot.slane %v1955_v7, %v517_v5  ;;  %s1658_s11 = smov [#allocation12]  }
  0xbb   : > { %v557_v20 = vsub.s32 2, %v1949_v2  ;;  %v562_v22 = vrot.slane %v1955_v7, %v561_v18  ;;  %v601_v25 = vsub.s32 7, %v1949_v2  ;;  %v597_v27 = vsub.s32 3, %v1949_v2  ;;  %p1566_p9 = pnand %p1565_p12, %p2252_p7  ;;  %s1568_s4 = sshll.u32 %s1658_s11, 4  ;;  %s1569_s4 = int_to_ptr.vmem [resolvable:$false] %s1568_s4 }
  0xbc   : > { %v490_v15 = vrot.slane %v482_v9, %v477_v3  ;;  %v486_v16 = vrot.slane %v478_v10, %v477_v3  ;;  %v530_v17 = vrot.slane %v522_v11, %v517_v5  ;;  %v526_v19 = vrot.slane %v518_v12, %v517_v5  ;;  %s1570_s23 = scalar_lea.vmem %s1569_s4, 256  ;;  %p1571_p8 = scmp.lt.s32.totalorder %s2163_s10, %s1569_s4 }
  0xbd   : > { %v558_v23 = vrot.slane %v1955_v7, %v557_v20  ;;  %v570_v24 = vrot.slane %v562_v22, %v557_v20  ;;  %v602_v28 = vrot.slane %v1955_v7, %v601_v25  ;;  %v598_v29 = vrot.slane %v1955_v7, %v597_v27  ;;  %p1567_p3 = pneg %p1566_p9  ;;  %p1572_p0 = scmp.lt.s32.totalorder %s1570_s23, %s1564_s1 }
  0xbe   : > { %vm492_vm0 = vcmp.eq.s32.totalorder %v1949_v2, %v490_v15  ;;  %vm494_vm1 = vcmp.eq.s32.totalorder %v1958_v8, %v490_v15  ;;  %vm491_vm2 = vcmp.eq.s32.totalorder %v1949_v2, %v486_v16  ;;  %vm493_vm3 = vcmp.eq.s32.totalorder %v1958_v8, %v486_v16 }
  0xbf   : > { %vm1268_vm4 = vmpackc.low %vm494_vm1, %vm492_vm0  ;;  %vm496_vm5 = vcmp.eq.s32.totalorder %v1965_v13, %v490_v15  ;;  %vm498_vm6 = vcmp.eq.s32.totalorder %v1968_v14, %v490_v15  ;;  %vm495_vm7 = vcmp.eq.s32.totalorder %v1965_v13, %v486_v16  ;;  %vm497_vm8 = vcmp.eq.s32.totalorder %v1968_v14, %v486_v16  ;;  %p1573_p10 = por %p1572_p0, %p1571_p8 }
  0xc0   : > { %1269 = vmatprep.subr.msk.bf16.mxu0 %vm1268_vm4, %v1655_v21  ;;  %1300 = vmatprep.subr.msk.bf16.mxu1 %vm1268_vm4, %v1655_v21  ;;  %vm1270_vm9 = vmpackc.low %vm493_vm3, %vm491_vm2  ;;  %vm532_vm10 = vcmp.eq.s32.totalorder %v1949_v2, %v530_v17  ;;  %vm534_vm11 = vcmp.eq.s32.totalorder %v1958_v8, %v530_v17  ;;  %vm531_vm15 = vcmp.eq.s32.totalorder %v1949_v2, %v526_v19  ;;  %v405_v38 = vsub.f32 100.0, %v404_v37 }
  0xc1   : > { %1271 = vmatpush1.bf16.msk.msra.mxu0 %vm1270_vm9, %v1655_v21  ;;  %1308 = vmatpush1.bf16.msk.msra.mxu1 %vm1270_vm9, %v1655_v21  ;;  %vm1272_vm12 = vmpackc.low %vm498_vm6, %vm496_vm5  ;;  %vm533_vm0 = vcmp.eq.s32.totalorder %v1958_v8, %v526_v19  ;;  %vm536_vm1 = vcmp.eq.s32.totalorder %v1965_v13, %v530_v17  ;;  %vm538_vm2 = vcmp.eq.s32.totalorder %v1968_v14, %v530_v17  ;;  %v380_v50 = vand.u32 2147483647, %v379_v45  ;;  %p1574_p1 = pnand %p1573_p10, %p1567_p3 }
  0xc2   : > { %1273 = vmatprep.subr.msk.bf16.mxu0 %vm1272_vm12, %v1655_v21  ;;  %1301 = vmatprep.subr.msk.bf16.mxu1 %vm1272_vm12, %v1655_v21  ;;  %vm1274_vm13 = vmpackc.low %vm497_vm8, %vm495_vm7  ;;  %vm535_vm5 = vcmp.eq.s32.totalorder %v1965_v13, %v526_v19  ;;  %vm537_vm6 = vcmp.eq.s32.totalorder %v1968_v14, %v526_v19  ;;  %v566_v26 = vrot.slane %v558_v23, %v557_v20  ;;  %v406_v39 = vmul.f32 0.01010101, %v405_v38 }
  0xc3   : > { %vm1276_vm14 = vmpackc.low %vm534_vm11, %vm532_vm10  ;;  %vm572_vm7 = vcmp.eq.s32.totalorder %v1949_v2, %v570_v24  ;;  %vm574_vm8 = vcmp.eq.s32.totalorder %v1958_v8, %v570_v24  ;;  %v610_v30 = vrot.slane %v602_v28, %v597_v27  ;;  %v606_v31 = vrot.slane %v598_v29, %v597_v27 }
  0xc4   : > { %vm1278_vm3 = vmpackc.low %vm533_vm0, %vm531_vm15  ;;  %vm571_vm11 = vcmp.eq.s32.totalorder %v1949_v2, %v566_v26  ;;  %vm573_vm12 = vcmp.eq.s32.totalorder %v1958_v8, %v566_v26  ;;  %v381_v53 = vsub.f32 0.0, %v380_v50 }
  0xc5   : > { %1275 = vmatpush1.bf16.msk.msra.mxu0 %vm1274_vm13, %v1655_v21  ;;  %1309 = vmatpush1.bf16.msk.msra.mxu1 %vm1274_vm13, %v1655_v21  ;;  %vm1280_vm4 = vmpackc.low %vm538_vm2, %vm536_vm1  ;;  %vm576_vm13 = vcmp.eq.s32.totalorder %v1965_v13, %v570_v24  ;;  %vm575_vm1 = vcmp.eq.s32.totalorder %v1965_v13, %v566_v26  ;;  %vm577_vm2 = vcmp.eq.s32.totalorder %v1968_v14, %v566_v26 }
  0xc6   : > { %1277 = vmatprep.subr.msk.bf16.mxu0 %vm1276_vm14, %v1655_v21  ;;  %1302 = vmatprep.subr.msk.bf16.mxu1 %vm1276_vm14, %v1655_v21  ;;  %vm1282_vm9 = vmpackc.low %vm537_vm6, %vm535_vm5  ;;  %vm578_vm14 = vcmp.eq.s32.totalorder %v1968_v14, %v570_v24  ;;  %v382_v56 = vmul.f32 1.442695, %v381_v53 }
  0xc7   : > { %vm1284_vm10 = vmpackc.low %vm574_vm8, %vm572_vm7  ;;  %vm611_vm7 = vcmp.eq.s32.totalorder %v1949_v2, %v606_v31  ;;  %vm613_vm8 = vcmp.eq.s32.totalorder %v1958_v8, %v606_v31 }
  0xc8   : > { %vm1286_vm15 = vmpackc.low %vm573_vm12, %vm571_vm11  ;;  %1402 = vpow2.f32 %v382_v56 }
  0xc9   : > { %1279 = vmatpush1.bf16.msk.msra.mxu0 %vm1278_vm3, %v1655_v21  ;;  %1310 = vmatpush1.bf16.msk.msra.mxu1 %vm1278_vm3, %v1655_v21  ;;  %vm1288_vm0 = vmpackc.low %vm578_vm14, %vm576_vm13  ;;  %vm612_vm3 = vcmp.eq.s32.totalorder %v1949_v2, %v610_v30  ;;  %vm615_vm13 = vcmp.eq.s32.totalorder %v1965_v13, %v606_v31  ;;  %vm617_vm14 = vcmp.eq.s32.totalorder %v1968_v14, %v606_v31 }
  0xca   : > { %1281 = vmatprep.subr.msk.bf16.mxu0 %vm1280_vm4, %v1655_v21  ;;  %1303 = vmatprep.subr.msk.bf16.mxu1 %vm1280_vm4, %v1655_v21  ;;  %vm614_vm4 = vcmp.eq.s32.totalorder %v1958_v8, %v610_v30  ;;  %vm1290_vm5 = vmpackc.low %vm577_vm2, %vm575_vm1  ;;  %vm411_vm1 = vcmask 1043456   ;;  %vm384_vm2 = vcmp.ge.f32.partialorder %v379_v45, 0.0 }
  0xcb   : > { %vm1292_vm6 = vmpackc.low %vm614_vm4, %vm612_vm3  ;;  %vm2079_vm3 = vcmp.lt.s32.totalorder %v470_v0, 256 }
  0xcc   : > { %vm1294_vm11 = vmpackc.low %vm613_vm8, %vm611_vm7 }
  0xcd   : > { %1283 = vmatpush1.bf16.msk.msra.mxu0 %vm1282_vm9, %v1655_v21  ;;  %1311 = vmatpush1.bf16.msk.msra.mxu1 %vm1282_vm9, %v1655_v21  ;;  %vm616_vm9 = vcmp.eq.s32.totalorder %v1965_v13, %v610_v30 }
  0xce   : > { %1285 = vmatprep.subr.msk.bf16.mxu0 %vm1284_vm10, %v1655_v21  ;;  %1304 = vmatprep.subr.msk.bf16.mxu1 %vm1284_vm10, %v1655_v21  ;;  %vm618_vm10 = vcmp.eq.s32.totalorder %v1968_v14, %v610_v30 }
  0xcf   : > { %vm1296_vm12 = vmpackc.low %vm618_vm10, %vm616_vm9 }
  0xd1   : > { %1287 = vmatpush1.bf16.msk.msra.mxu0 %vm1286_vm15, %v1655_v21  ;;  %1312 = vmatpush1.bf16.msk.msra.mxu1 %vm1286_vm15, %v1655_v21  ;;  %vm1298_vm15 = vmpackc.low %vm617_vm14, %vm615_vm13 }
  0xd2   : > { %1289 = vmatprep.subr.msk.bf16.mxu0 %vm1288_vm0, %v1655_v21  ;;  %1305 = vmatprep.subr.msk.bf16.mxu1 %vm1288_vm0, %v1655_v21  ;;  %vm375_vm0 = vcmp.ge.s32.totalorder %v1955_v7, 0  ;;  %v1403_v5 = vpop.eup %1402 }
  0xd3   : > { %v1246_v41 = vsel %vm375_vm0, 1.0, %v1656_v40  ;;  %v387_v6 = vadd.f32 1.0, %v1403_v5  ;;  %v385_v9 = vsel %vm384_vm2, %v1403_v5, 1.0 }
  0xd4   : > { %v407_v42 = vmul.f32 %v1246_v41, %v406_v39  ;;  %v386_v10 = vmul.f32 %v1246_v41, %v385_v9 }
  0xd5   : > { %1291 = vmatpush1.bf16.msk.msra.mxu0 %vm1290_vm5, %v1655_v21  ;;  %1313 = vmatpush1.bf16.msk.msra.mxu1 %vm1290_vm5, %v1655_v21  ;;  %1404 = vrcp.f32 %v387_v6 }
  0xd6   : > { %1293 = vmatprep.subr.msk.bf16.mxu0 %vm1292_vm6, %v1655_v21  ;;  %1306 = vmatprep.subr.msk.bf16.mxu1 %vm1292_vm6, %v1655_v21  ;;  %v409_v43 = vcombine.high %v407_v42, %v407_v42  ;;  %v412_v46 = vsel %vm411_vm1, %v407_v42, -inf }
  0xd7   : > { %v413_v48 = vrot.slane %v412_v46, 4 }
  0xd8   : > { %v419_v47 = vsel %vm411_vm1, %v409_v43, -inf }
  0xd9   : > { %1295 = vmatpush1.bf16.msk.msra.mxu0 %vm1294_vm11, %v1655_v21  ;;  %1314 = vmatpush1.bf16.msk.msra.mxu1 %vm1294_vm11, %v1655_v21  ;;  %v420_v49 = vrot.slane %v419_v47, 4  ;;  %v414_v51 = vmax.f32 %v412_v46, %v413_v48  ;;  %v1657_v46 = vmov 1966171168  }
  0xda   : > { %1297 = vmatprep.subr.msk.bf16.mxu0 %vm1296_vm12, %v1655_v21  ;;  %1307 = vmatprep.subr.msk.bf16.mxu1 %vm1296_vm12, %v1655_v21 }
  0xdb   : > { %v421_v52 = vmax.f32 %v419_v47, %v420_v49  ;;  %v415_v54 = vrot.slane %v414_v51, 2  ;;  %v871_v47 = vunpack.c.l.s4 %v1657_v46 }
  0xdd   : > { %1299 = vmatpush1.bf16.msk.msra.mxu0 %vm1298_vm15, %v1655_v21  ;;  %1315 = vmatpush1.bf16.msk.msra.mxu1 %vm1298_vm15, %v1655_v21  ;;  %v422_v55 = vrot.slane %v421_v52, 2  ;;  %v416_v57 = vmax.f32 %v414_v51, %v415_v54  ;;  %v872_v50 = vunpack.c.0.s8 %v871_v47 }
  0xdf   : > { %v423_v58 = vmax.f32 %v421_v52, %v422_v55  ;;  %v417_v59 = vrot.slane %v416_v57, 1  ;;  %v1405_v12 = vpop.eup %1404  ;;  %v2074_v52 = vsub.s32 %v872_v50, %v1949_v2 }
  0xe0   : > { %721 = vmatmul.mubr.bf16.vlgmr.msra.gmra.mrb[0].mxu0 %v1397_v32  ;;  %751 = vmatmul.mubr.bf16.vlgmr.msra.gmra.mrb[0].mxu1 %v1398_v33  ;;  %v389_v13 = vmul.f32 %v1405_v12, %v386_v10 }
  0xe1   : > { %730 = vmatprep.mubr.bf16.mxu0 %v1654_v1  ;;  %760 = vmatprep.mubr.bf16.mxu1 %v1654_v1  ;;  %v424_v60 = vrot.slane %v423_v58, 1  ;;  %v418_v61 = vmax.f32 %v416_v57, %v417_v59 }
  0xe3   : > { %v425_v62 = vmax.f32 %v423_v58, %v424_v60  ;;  %v426_v63 = vmax.f32 %v418_v61, 1e-10 }
  0xe5   : > { %v437_v11 = vsub.f32 1e-10, %v426_v63 }
  0xe7   : > { %v439_v15 = vmul.f32 10000.0, %v437_v11 }
  0xe8   : > { %731 = vmatmul.mubr.bf16.gmra.mrb[4].mxu0 %v1399_v34  ;;  %761 = vmatmul.mubr.bf16.gmra.mrb[4].mxu1 %v1400_v35 }
  0xe9   : > { %740 = vmatprep.mubr.bf16.mxu0 %v1654_v1  ;;  %v427_v1 = vmax.f32 %v425_v62, 1e-10  ;;  %v441_v19 = vmul.f32 1.442695, %v439_v15 }
  0xeb   : > { %v430_v3 = vcombine.low %v426_v63, %v427_v1  ;;  %v438_v14 = vsub.f32 1e-10, %v427_v1 }
  0xed   : > { %v432_v4 = vsub.f32 %v407_v42, %v430_v3  ;;  %v440_v18 = vmul.f32 10000.0, %v438_v14  ;;  %v390_v42 = vsub.f32 1.0, %v389_v13 }
  0xef   : > { %v433_v7 = vmul.f32 10000.0, %v432_v4  ;;  %v443_v20 = vmul.f32 1.442695, %v440_v18  ;;  %v1247_v43 = vrot.slane %v390_v42, 9  ;;  %v1248_v45 = vrot.slane %v390_v42, 10 }
  0xf0   : > { %741 = vmatmul.mubr.bf16.gmra.mrb[8].mxu0 %v1401_v36  ;;  %v1249_v49 = vrot.slane %v390_v42, 11  ;;  %v980_v18 = vld [vmem:[%s1930_s27] sm:$0xf0] }
  0xf1   : > { %v434_v8 = vmul.f32 1.442695, %v433_v7  ;;  %v395_v44 = vmul.f32 %v1247_v43, %v390_v42 }
  0xf3   : > { %1406 = vpow2.f32 %v434_v8  ;;  %v399_v48 = vmul.f32 %v1248_v45, %v395_v44  ;;  %v834_v44 = vld [vmem:[%s1930_s27 + $0x18] sm:$0xf] }
  0xf4   : > { %1408 = vpow2.f32 %v441_v19 }
  0xf5   : > { %1410 = vpow2.f32 %v443_v20  ;;  %v403_v51 = vmul.f32 %v1249_v49, %v399_v48 }
  0xf7   : > { %v1044_v53 = vsub.f32 1.0, %v403_v51 }
  0xf9   : > { %v1052_v54 = vrot.slane %v1044_v53, %v2074_v52 }
  0xfb   : > { %v1059_v55 = vrot.slane %v1052_v54, %v2074_v52 }
  0xfd   : > { %v1407_v16 = vpop.eup %1406  ;;  %1257 = vst.msk [vmem:[%s2084_s29 + $0x3] ss:$4 sm:$0x3] %vm2079_vm3, %v1059_v55  ;;  %v992_v55 = vld [vmem:[%s1930_s27 + $0x10] sm:$0xf] }
  0xfe   : > { %v2052_v17 = vmul.f32 %v1407_v16, %v389_v13  ;;  %v2059_v33 = vpop.eup %1408 }
  0xff   : > { %v445_v34 = vmax.f32 %v2059_v33, 1e-10  ;;  %v2062_v37 = vpop.eup %1410 }
 0x100   : > { %v448_v21 = vcombine.high %v2052_v17, %v2052_v17  ;;  %v450_v22 = vsel %vm411_vm1, %v2052_v17, 0.0  ;;  %v446_v38 = vmax.f32 %v2062_v37, 1e-10 }
 0x101   : > { %v451_v23 = vrot.slane %v450_v22, 4 }
 0x102   : > { %v457_v24 = vsel %vm411_vm1, %v448_v21, 0.0 }
 0x103   : > { %v452_v25 = vadd.f32 %v451_v23, %v450_v22  ;;  %v458_v26 = vrot.slane %v457_v24, 4  ;;  %v981_v22 = vld [vmem:[%s1930_s27 + $0x8] sm:$0xf0] }
 0x105   : > { %v453_v27 = vrot.slane %v452_v25, 2  ;;  %v459_v28 = vadd.f32 %v458_v26, %v457_v24 }
 0x107   : > { %v454_v29 = vadd.f32 %v453_v27, %v452_v25  ;;  %v460_v30 = vrot.slane %v459_v28, 2  ;;  %v900_v27 = vld [vmem:[%s1930_s27] sm:$0xf0] }
 0x109   : > { %v455_v31 = vrot.slane %v454_v29, 1  ;;  %v461_v32 = vadd.f32 %v460_v30, %v459_v28 }
 0x10b   : > { %v456_v35 = vadd.f32 %v455_v31, %v454_v29  ;;  %v462_v36 = vrot.slane %v461_v32, 1  ;;  %v901_v31 = vld [vmem:[%s1930_s27 + $0x8] sm:$0xf0] }
 0x10d   : > { %v463_v39 = vadd.f32 %v462_v36, %v461_v32  ;;  %v2067_v40 = vadd.f32 %v456_v35, %v445_v34  ;;  %v833_v36 = vld [vmem:[%s1930_s27 + $0x10] sm:$0xf] }
 0x10f   : > { %v2071_v41 = vadd.f32 %v463_v39, %v446_v38  ;;  %1412 = vrcp.f32 %v2067_v40 }
 0x111   : > { %1414 = vrcp.f32 %v2071_v41 }
 0x1b3   : > { %v2089_v57 = vpop.f32.mrb[0].mxu0  ;;  %v752_v2 = vpop.f32.mrb[0].mxu1 }
 0x1b4   : > { %v2091_v58 = vpop.f32.mrb[1].mxu0  ;;  %v785_v59 = vrot.slane %v752_v2, 4  ;;  %v2093_v60 = vpop.f32.mrb[1].mxu1 }
 0x1b5   : > { %v726_v61 = vpop.f32.mrb[2].mxu0  ;;  %v787_v0 = vrot.slane %v2093_v60, 4  ;;  %v756_v62 = vpop.f32.mrb[2].mxu1 }
 0x1b6   : > { %v2096_v63 = vpop.f32.mrb[3].mxu0  ;;  %v789_v1 = vrot.slane %v756_v62, 4  ;;  %v758_v3 = vpop.f32.mrb[3].mxu1 }
 0x1b7   : > { %v791_v4 = vrot.slane %v758_v3, 4 }
 0x1b8   : > { %v790_v5 = vsel %vm411_vm1, %v785_v59, %v789_v1 }
 0x1b9   : > { %v792_v6 = vsel %vm411_vm1, %v787_v0, %v791_v4 }
 0x1bb   : > { %v732_v7 = vpop.f32.mrb[4].mxu0  ;;  %v762_v8 = vpop.f32.mrb[4].mxu1 }
 0x1bc   : > { %v811_v9 = vadd.f32 %v790_v5, %v732_v7  ;;  %v793_v10 = vrot.slane %v762_v8, 4  ;;  %v734_v11 = vpop.f32.mrb[5].mxu0  ;;  %v764_v12 = vpop.f32.mrb[5].mxu1  ;;  %v821_v5 = vld [vmem:[%s1930_s27] sm:$0xf0] }
 0x1bd   : > { %v812_v13 = vadd.f32 %v792_v6, %v734_v11  ;;  %v795_v14 = vrot.slane %v764_v12, 4  ;;  %v736_v15 = vpop.f32.mrb[6].mxu0  ;;  %v766_v16 = vpop.f32.mrb[6].mxu1  ;;  %v976_v6 = vld [vmem:[%s1930_s27] sm:$0xf] }
 0x1be   : > { %v794_v19 = vsel %vm411_vm1, %v789_v1, %v793_v10  ;;  %v738_v20 = vpop.f32.mrb[7].mxu0  ;;  %v767_v21 = vpop.f32.mrb[7].mxu1  ;;  %v904_v25 = vrot.slane %v811_v9, 4  ;;  %v982_v28 = vmul.f32 %v980_v18, %v811_v9  ;;  %v993_v7 = vld [vmem:[%s1930_s27 + $0x18] sm:$0xf] }
 0x1bf   : > { %v2103_v23 = vadd.f32 %v794_v19, %v736_v15  ;;  %v796_v24 = vsel %vm411_vm1, %v791_v4, %v795_v14  ;;  %v905_v29 = vrot.slane %v812_v13, 4  ;;  %v983_v30 = vmul.f32 %v981_v22, %v812_v13  ;;  %v822_v12 = vld [vmem:[%s1930_s27 + $0x8] sm:$0xf0]  ;;  %v977_v13 = vld [vmem:[%s1930_s27 + $0x8] sm:$0xf] }
 0x1c0   : > { %v2106_v26 = vadd.f32 %v796_v24, %v738_v20  ;;  %v908_v35 = vmul.f32 %v904_v25, %v900_v27  ;;  %v986_v43 = vrot.slane %v982_v28, 4  ;;  %v890_v16 = vld [vmem:[%s1930_s27] sm:$0xf]  ;;  %v818_v22 = vld [vmem:[%s1930_s27 + $0x8] sm:$0xf] }
 0x1c1   : > { %v909_v47 = vmul.f32 %v905_v29, %v901_v31  ;;  %v987_v48 = vrot.slane %v983_v30, 4  ;;  %v835_v53 = vmul.f32 %v833_v36, %v2103_v23  ;;  %v922_v54 = vrot.slane %v2103_v23, 4  ;;  %v891_v23 = vld [vmem:[%s1930_s27 + $0x8] sm:$0xf]  ;;  %v918_v24 = vld [vmem:[%s1930_s27 + $0x10] sm:$0xf] }
 0x1c2   : > { %v912_v62 = vrot.slane %v908_v35, 4  ;;  %v836_v1 = vmul.f32 %v834_v44, %v2106_v26  ;;  %v923_v15 = vrot.slane %v2106_v26, 4  ;;  %v919_v29 = vld [vmem:[%s1930_s27 + $0x18] sm:$0xf] }
 0x1c3   : > { %v742_v32 = vpop.f32.mrb[8].mxu0 }
 0x1c4   : > { %v815_v39 = vadd.f32 %v793_v10, %v742_v32  ;;  %v744_v42 = vpop.f32.mrb[9].mxu0  ;;  %v779_v49 = vrot.slane %v742_v32, 4 }
 0x1c5   : > { %v816_v45 = vadd.f32 %v795_v14, %v744_v42  ;;  %v746_v46 = vpop.f32.mrb[10].mxu0  ;;  %v782_v2 = vrot.slane %v744_v42, 4  ;;  %v913_v14 = vrot.slane %v909_v47, 4  ;;  %v927_v47 = vmul.f32 %v923_v15, %v919_v29 }
 0x1c6   : > { %v780_v50 = vrot.slane %v746_v46, 4  ;;  %v748_v51 = vpop.f32.mrb[11].mxu0  ;;  %v994_v19 = vmul.f32 %v992_v55, %v815_v39  ;;  %v926_v39 = vmul.f32 %v922_v54, %v918_v24 }
 0x1c7   : > { %v783_v60 = vrot.slane %v748_v51, 4 }
 0x1c8   : > { %v781_v3 = vsel %vm411_vm1, %v779_v49, %v780_v50  ;;  %v786_v4 = vsel %vm411_vm1, %v780_v50, %v785_v59  ;;  %v817_v59 = vld [vmem:[%s1930_s27] sm:$0xf] }
 0x1c9   : > { %v807_v8 = vadd.f32 %v781_v3, %v2089_v57  ;;  %v809_v9 = vadd.f32 %v786_v4, %v726_v61  ;;  %v784_v10 = vsel %vm411_vm1, %v782_v2, %v783_v60  ;;  %v788_v11 = vsel %vm411_vm1, %v783_v60, %v787_v0 }
 0x1ca   : > { %v808_v18 = vadd.f32 %v784_v10, %v2091_v58  ;;  %v810_v57 = vadd.f32 %v788_v11, %v2096_v63  ;;  %v995_v0 = vmul.f32 %v993_v7, %v816_v45 }
 0x1cb   : > { %v823_v61 = vmul.f32 %v821_v5, %v809_v9  ;;  %v894_v20 = vrot.slane %v807_v8, 4  ;;  %v978_v21 = vmul.f32 %v976_v6, %v809_v9  ;;  %v819_v26 = vmul.f32 %v817_v59, %v807_v8 }
 0x1cc   : > { %v824_v25 = vmul.f32 %v822_v12, %v810_v57  ;;  %v895_v27 = vrot.slane %v808_v18, 4  ;;  %v979_v28 = vmul.f32 %v977_v13, %v810_v57  ;;  %v820_v35 = vmul.f32 %v818_v22, %v808_v18 }
 0x1cd   : > { %v827_v30 = vrot.slane %v823_v61, 4  ;;  %v898_v31 = vmul.f32 %v894_v20, %v890_v16  ;;  %v990_v32 = vadd.f32 %v986_v43, %v978_v21 }
 0x1ce   : > { %v828_v58 = vrot.slane %v824_v25, 4  ;;  %v899_v36 = vmul.f32 %v895_v27, %v891_v23  ;;  %v991_v63 = vadd.f32 %v987_v48, %v979_v28  ;;  %v861_v28 = vmul.f32 0.0, %v445_v34 }
 0x1cf   : > { %v831_v42 = vadd.f32 %v827_v30, %v819_v26  ;;  %v916_v44 = vadd.f32 %v912_v62, %v898_v31  ;;  %v996_v46 = vadd.f32 %v994_v19, %v990_v32  ;;  %v1413_v30 = vpop.eup %1412 }
 0x1d0   : > { %v832_v49 = vadd.f32 %v828_v58, %v820_v35  ;;  %v917_v50 = vadd.f32 %v913_v14, %v899_v36  ;;  %v997_v45 = vadd.f32 %v995_v0, %v991_v63  ;;  %v862_v36 = vmul.f32 0.0, %v446_v38 }
 0x1d1   : > { %v837_v51 = vadd.f32 %v835_v53, %v831_v42  ;;  %v928_v55 = vadd.f32 %v926_v39, %v916_v44 }
 0x1d2   : > { %v838_v2 = vadd.f32 %v836_v1, %v832_v49  ;;  %v929_v60 = vadd.f32 %v927_v47, %v917_v50  ;;  %v1000_v3 = vcombine.low %v996_v46, %v997_v45  ;;  %v1415_v49 = vpop.eup %1414 }
 0x1d4   : > { %v841_v4 = vcombine.low %v837_v51, %v838_v2  ;;  %v932_v5 = vcombine.low %v928_v55, %v929_v60  ;;  %v1002_v43 = vmul.f32 %v1000_v3, %v2052_v17 }
 0x1d6   : > { %v843_v6 = vmul.f32 %v841_v4, %v2052_v17  ;;  %v934_v48 = vmul.f32 %v932_v5, %v2052_v17  ;;  %v1004_v54 = vcombine.high %v1002_v43, %v1002_v43  ;;  %v1006_v62 = vsel %vm411_vm1, %v1002_v43, 0.0 }
 0x1d7   : > { %v1007_v7 = vrot.slane %v1006_v62, 4 }
 0x1d8   : > { %v845_v8 = vcombine.high %v843_v6, %v843_v6  ;;  %v847_v53 = vsel %vm411_vm1, %v843_v6, 0.0  ;;  %v936_v1 = vcombine.high %v934_v48, %v934_v48  ;;  %v938_v9 = vsel %vm411_vm1, %v934_v48, 0.0 }
 0x1d9   : > { %v848_v10 = vrot.slane %v847_v53, 4  ;;  %v939_v11 = vrot.slane %v938_v9, 4  ;;  %v1008_v12 = vadd.f32 %v1007_v7, %v1006_v62  ;;  %v1013_v13 = vsel %vm411_vm1, %v1004_v54, 0.0 }
 0x1da   : > { %v854_v17 = vsel %vm411_vm1, %v845_v8, 0.0  ;;  %v945_v14 = vsel %vm411_vm1, %v936_v1, 0.0  ;;  %v1014_v15 = vrot.slane %v1013_v13, 4 }
 0x1db   : > { %v849_v40 = vadd.f32 %v848_v10, %v847_v53  ;;  %v855_v59 = vrot.slane %v854_v17, 4  ;;  %v940_v16 = vadd.f32 %v939_v11, %v938_v9  ;;  %v946_v18 = vrot.slane %v945_v14, 4 }
 0x1dc   : > { %v1009_v57 = vrot.slane %v1008_v12, 2  ;;  %v1015_v19 = vadd.f32 %v1014_v15, %v1013_v13 }
 0x1dd   : > { %v850_v61 = vrot.slane %v849_v40, 2  ;;  %v856_v20 = vadd.f32 %v855_v59, %v854_v17  ;;  %v941_v21 = vrot.slane %v940_v16, 2  ;;  %v947_v22 = vadd.f32 %v946_v18, %v945_v14 }
 0x1de   : > { %v1010_v23 = vadd.f32 %v1009_v57, %v1008_v12  ;;  %v1016_v24 = vrot.slane %v1015_v19, 2 }
 0x1df   : > { %v851_v0 = vadd.f32 %v850_v61, %v849_v40  ;;  %v857_v25 = vrot.slane %v856_v20, 2  ;;  %v942_v41 = vadd.f32 %v941_v21, %v940_v16  ;;  %v948_v27 = vrot.slane %v947_v22, 2 }
 0x1e0   : > { %v1011_v29 = vrot.slane %v1010_v23, 1  ;;  %v1017_v26 = vadd.f32 %v1016_v24, %v1015_v19 }
 0x1e1   : > { %v852_v31 = vrot.slane %v851_v0, 1  ;;  %v858_v32 = vadd.f32 %v857_v25, %v856_v20  ;;  %v943_v35 = vrot.slane %v942_v41, 1  ;;  %v949_v58 = vadd.f32 %v948_v27, %v947_v22 }
 0x1e2   : > { %v1012_v63 = vadd.f32 %v1011_v29, %v1010_v23  ;;  %v1018_v39 = vrot.slane %v1017_v26, 1 }
 0x1e3   : > { %v853_v42 = vadd.f32 %v852_v31, %v851_v0  ;;  %v859_v44 = vrot.slane %v858_v32, 1  ;;  %v944_v46 = vadd.f32 %v943_v35, %v942_v41  ;;  %v950_v47 = vrot.slane %v949_v58, 1 }
 0x1e4   : > { %v1019_v50 = vadd.f32 %v1018_v39, %v1017_v26  ;;  %v1020_v33 = vadd.f32 %v1012_v63, %v861_v28 }
 0x1e5   : > { %v860_v34 = vadd.f32 %v859_v44, %v858_v32  ;;  %v863_v45 = vadd.f32 %v861_v28, %v853_v42  ;;  %v951_v51 = vadd.f32 %v950_v47, %v949_v58  ;;  %v952_v55 = vadd.f32 %v944_v46, %v861_v28 }
 0x1e6   : > { %v1021_v2 = vadd.f32 %v1019_v50, %v862_v36  ;;  %v1022_v60 = vmul.f32 %v1413_v30, %v1020_v33 }
 0x1e7   : > { %v864_v3 = vadd.f32 %v862_v36, %v860_v34  ;;  %v865_v37 = vmul.f32 %v1413_v30, %v863_v45  ;;  %v953_v38 = vadd.f32 %v951_v51, %v862_v36  ;;  %v954_v4 = vmul.f32 %v1413_v30, %v952_v55 }
 0x1e8   : > { %v1023_v5 = vmul.f32 %v1415_v49, %v1021_v2 }
 0x1e9   : > { %v866_v43 = vmul.f32 %v1415_v49, %v864_v3  ;;  %v955_v6 = vmul.f32 %v1415_v49, %v953_v38 }
 0x1ea   : > { %v1026_v48 = vcombine.low %v1022_v60, %v1023_v5 }
 0x1eb   : > { %v869_v54 = vcombine.low %v865_v37, %v866_v43  ;;  %v958_v62 = vcombine.low %v954_v4, %v955_v6 }
 0x1ec   : > { %v1033_v7 = vrot.slane %v1026_v48, %v2074_v52 }
 0x1ed   : > { %v876_v8 = vrot.slane %v869_v54, %v2074_v52  ;;  %v965_v53 = vrot.slane %v958_v62, %v2074_v52 }
 0x1ee   : > { %v1040_v1 = vrot.slane %v1033_v7, %v2074_v52 }
 0x1ef   : > { %v883_v9 = vrot.slane %v876_v8, %v2074_v52  ;;  %v972_v10 = vrot.slane %v965_v53, %v2074_v52 }
 0x1f0   : > { %1256 = vst.msk [vmem:[%s2084_s29 + $0x2] ss:$4 sm:$0x3] %vm2079_vm3, %v1040_v1 }
 0x1f1   : > { %889 = vst.msk [vmem:[%s2084_s29] ss:$4 sm:$0x3] %vm2079_vm3, %v883_v9  ;;  %1255 = vst.msk [vmem:[%s2084_s29 + $0x1] ss:$4 sm:$0x3] %vm2079_vm3, %v972_v10 }
 0x1f2   : > { %1577 = shalt.err (!%p1574_p1)
}
 0x1f3   : > { %s1578_s14 = scalar_lea.hbm %s2161_s25, 128  ;;  %s1582_s16 = scalar_lea.hbm %s2219_s5, 256 }
 0x1f4   : > { %p1579_p11 = scmp.ne.s32.totalorder %s2161_s25, %s1578_s14  ;;  %p1583_p6 = scmp.lt.u32.totalorder %s2161_s25, %s2219_s5 }
 0x1f5   : > { %p1584_p4 = scmp.lt.u32.totalorder %s1582_s16, %s1578_s14  ;;  %p1586_p12 = scmp.lt.u32.totalorder %s1578_s14, %s2161_s25 }
 0x1f6   : > { %p1580_p13 = pnand %p1579_p11, %p2252_p7 }
 0x1f7   : > { %p1585_p2 = por %p1584_p4, %p1583_p6 }
 0x1f8   : > { %p1581_p5 = pneg %p1580_p13 }
 0x1f9   : > { %p1587_p9 = por %p1586_p12, %p1585_p2 }
 0x1fb   : > { %p1588_p3 = pnand %p1587_p9, %p1581_p5 }
 0x1fd   : > { %1591 = shalt.err (!%p1588_p3)
}
 0x1fe   : > { %1328 = dma.vmem_to_hbm [thread:$0]  (%p2252_p7), %s2163_s10, 128, %s2161_s25, %s1064_s22  }
 0x1ff PF: > { %s1090_s9 = sand.u32 1, %s1630_s18   ;;  %p2253_p8 = scmp.ne.s32.totalorder %s2232_s6, 0 }
 0x200   : > { %p2254_p0 = scmp.ge.s32.totalorder %s1642_s21, 2  ;;  %s1091_s8 = scalar_lea.sflag [#allocation5], %s1090_s9 }
 0x202   : > { %p1348_p10 = pnand %p2254_p0, %p2253_p8 }
 0x204   : > { %1625 = dma.done.wait (!%p1348_p10), %s1091_s8, 128  }
 0x205   : > { %1627 = vsyncadd (!%p1348_p10), %s1091_s8, 4294967168  ;;  %s2255_s17 = sld [smem:[#allocation18_spill]]  ;;  %p24_p1 = scmp.ge.s32.totalorder %s1714_s24, 4  }
 0x206   : > { %s2256_s18 = smov %s1634_s19  ;;  %s2257_s19 = smov %s1638_s20 }
 0x207   : > { %s2259_s21 = smov %s1714_s24  ;;  %26 = sbr.rel (!%p24_p1) target bundleno = 12 (0xc), region = 129 }
 0x20b   : > { %s2258_s20 = smov %s2255_s17 }
 0x20e   :  { %1096 = vsyncpa [#allocation4], 1 }
 0x20f   :  { %1098 = vsyncpa [#allocation4 + $0x1], 1 }
 0x210   :  { %1099 = vsyncpa [#allocation7], 1 }
 0x211   :  { %1101 = vsyncpa [#allocation7 + $0x1], 1 }
 0x212   :  { %1102 = vsyncpa [#allocation10], 1 }
 0x213   :  { %1104 = vsyncpa [#allocation10 + $0x1], 1 }
 0x214   :  { %1105 = vsyncpa [#allocation5], 1 }
 0x215   :  { %1107 = vsyncpa [#allocation5 + $0x1], 1 }

</bundles_post_ra>
